<compile_context>
chip_gen: v5e
topology: v5e:2x2
jax: 0.10.0
libtpu: 0.0.40
codegen_flags: <defaults>
</compile_context>

<pallas_src>
import jax
import jax.numpy as jnp
from jax.experimental import pallas as pl
from jax.experimental.pallas import tpu as pltpu


# --------------------------------------------------------------------------- #
# Kernel                                                                      #
# --------------------------------------------------------------------------- #
def _make_kernel(n_way, with_logits):
    def kernel(y_ref, s_ref, qt_ref, pred_ref, *rest):
        # y_ref    : (TB, 1,   NKs) int32   support labels
        # s_ref    : (TB, NKs, D)   cdt     support features
        # qt_ref   : (TB, D,   NKq) cdt     query features (pre-transposed)
        # pred_ref : (1, TB, NKq)           int32
        # rest[0]  : (1, TB, n_way, NKq)    f32   (only if with_logits)
        labels = y_ref[...]
        s = s_ref[...]
        qt = qt_ref[...]
        TB, NKs, D = s.shape
        NKq = qt.shape[2]
        cdt = s.dtype

        # one-hot^T built in-register: y1h_t[b, n, k] = (label[b, k] == n)
        cls_iota = jax.lax.broadcasted_iota(jnp.int32, (TB, n_way, NKs), 1)
        y1h_t = (labels == cls_iota).astype(cdt)               # (TB, n_way, NKs)

        # class-wise feature SUM (mean's /count cancels under L2 normalization)
        # MXU-native: contraction k is lhs-last / rhs-second-to-last.
        proto = jnp.einsum("bnk,bkd->bnd", y1h_t, s,
                           preferred_element_type=jnp.float32)  # (TB, n_way, D) f32

        # raw class-major logits; qt is already (TB, D, NKq) so no XLU transpose
        logits_raw = jnp.einsum("bnd,bdq->bnq", proto.astype(cdt), qt,
                                preferred_element_type=jnp.float32)  # (TB,n_way,NKq)

        # F.normalize(p=2, eps=1e-12) applied post-matmul:
        #   x / max(||x||, eps) == x * rsqrt(max(sumsq, eps^2))
        p_ss = jnp.sum(proto * proto, axis=-1, keepdims=True)   # (TB, n_way, 1)
        inv_pn = jax.lax.rsqrt(jnp.maximum(p_ss, 1e-24))

        if with_logits:
            # per-query normalization only matters when logits are emitted
            q32 = qt.astype(jnp.float32)
            q_ss = jnp.sum(q32 * q32, axis=1, keepdims=True)    # (TB, 1, NKq)
            inv_qn = jax.lax.rsqrt(jnp.maximum(q_ss, 1e-24))
            scaled = logits_raw * inv_pn * inv_qn               # (TB, n_way, NKq)
            rest[0][0] = scaled
        else:
            # argmax over classes is invariant to a positive per-query scale,
            # so the q_ss reduce + rsqrt are skipped entirely in this path.
            scaled = logits_raw * inv_pn

        # argmax over classes, unrolled (n_way small & static); strict '>'
        # keeps the first occurrence on ties (matches torch/jnp argmax).
        best_val = scaled[:, 0, :]                              # (TB, NKq)
        best_idx = jnp.zeros((TB, NKq), dtype=jnp.int32)
        for c in range(1, n_way):
            v = scaled[:, c, :]
            take = v > best_val
            best_val = jnp.where(take, v, best_val)
            best_idx = jnp.where(take, jnp.int32(c), best_idx)

        pred_ref[0] = best_idx

    return kernel


# --------------------------------------------------------------------------- #
# VMEM sizing (layout-aware)                                                  #
# --------------------------------------------------------------------------- #
def _round_up(x, m):
    return ((x + m - 1) // m) * m


def _padded_tile_bytes(shape, dtype):
    """Bytes for a VMEM tile including (8,128) layout padding (sublane-packed
    dtypes pad the second-to-last dim to 16/32 instead of 8)."""
    itemsize = jnp.dtype(dtype).itemsize
    sub = max(8, 32 // itemsize)
    dims = list(shape)
    dims[-1] = _round_up(dims[-1], 128)
    if len(dims) >= 2:
        dims[-2] = _round_up(dims[-2], sub)
    total = itemsize
    for d in dims:
        total *= d
    return total


def _vmem_footprint(TB, *, NKs, NKq, D, n_way, cdt, with_logits):
    """Per-grid-step VMEM estimate: double-buffered pipeline tiles plus the
    in-kernel temporaries, all with (8,128) padding."""
    b = 0
    # pipeline inputs (double-buffered by BlockSpec)
    b += 2 * _padded_tile_bytes((TB, 1, NKs), jnp.int32)
    b += 2 * _padded_tile_bytes((TB, NKs, D), cdt)
    b += 2 * _padded_tile_bytes((TB, D, NKq), cdt)
    # pipeline outputs (double-buffered)
    b += 2 * _padded_tile_bytes((1, TB, NKq), jnp.int32)
    if with_logits:
        b += 2 * _padded_tile_bytes((1, TB, n_way, NKq), jnp.float32)
    # in-kernel temporaries (single copy, conservative)
    b += _padded_tile_bytes((TB, n_way, NKs), cdt)              # one-hot^T
    b += _padded_tile_bytes((TB, n_way, D), jnp.float32)        # proto (f32 acc)
    b += 3 * _padded_tile_bytes((TB, n_way, NKq), jnp.float32)  # logits_raw/scaled
    b += _padded_tile_bytes((TB, n_way, 1), jnp.float32)        # p_ss / inv_pn
    b += _padded_tile_bytes((TB, 1, NKq), jnp.float32)          # q_ss / inv_qn
    b += 2 * _padded_tile_bytes((TB, NKq), jnp.float32)         # best_val etc.
    b += _padded_tile_bytes((TB, NKq), jnp.int32)               # best_idx
    return b


def _vmem_limits():
    """Generation-aware (budget_for_tiles, scoped_vmem_limit) in bytes."""
    try:
        cap = int(getattr(pltpu.get_tpu_info(), "vmem_capacity_bytes", 0))
    except Exception:
        cap = 0
    if cap <= 0:
        cap = 64 << 20          # conservative fallback (v7x per-TC physical)
    vmem_limit = min(cap // 2, 64 << 20)   # what we ask Mosaic for
    budget = vmem_limit // 2               # headroom for compiler scratch
    return budget, vmem_limit


def _pick_tasks_per_block(B, budget_bytes, footprint_fn, *, min_grid=2):
    """Largest divisor TB of B whose padded footprint fits the budget, while
    keeping G = B // TB >= min_grid (when possible) so the 'parallel' grid
    axis can be sharded across both v7x TensorCores."""
    best = 1
    for t in range(1, B + 1):
        if B % t != 0:
            continue
        if B >= min_grid and (B // t) < min_grid:
            continue
        if footprint_fn(t) <= budget_bytes:
            best = t
    return best


# --------------------------------------------------------------------------- #
# Wrapper                                                                     #
# --------------------------------------------------------------------------- #
def prototype_net_forward(support_x, support_y, query_x, n_way, *,
                          return_logits=False, compute_dtype=None):
    """support_x: [B,N,Ks,D], support_y: [B,N,Ks] int, query_x: [B,N,Kq,D].

    Returns pred_y [B,N,Kq] int32 (matches the torch module's forward);
    with return_logits=True also returns logits [B,N,Kq,n_way] (forward_logits).
    """
    B, N, Ks, D = support_x.shape
    _, _, Kq, _ = query_x.shape
    assert N == n_way
    NKs, NKq = N * Ks, N * Kq

    if compute_dtype is None:
        # bf16 MXU operands in the pred-only path (argmax is robust to bf16);
        # keep f32 when exact logits are requested.
        compute_dtype = jnp.float32 if return_logits else jnp.bfloat16
    cdt = jnp.dtype(compute_dtype)

    s = support_x.reshape(B, NKs, D).astype(cdt)
    # query shipped pre-transposed (B, D, NKq): one-time XLA transpose so the
    # in-kernel logits matmul is MXU-native (no per-step XLU transpose).
    qt = jnp.swapaxes(query_x.reshape(B, NKq, D), 1, 2).astype(cdt)
    y = support_y.reshape(B, 1, NKs).astype(jnp.int32)

    budget, vmem_limit = _vmem_limits()
    footprint = lambda t: _vmem_footprint(t, NKs=NKs, NKq=NKq, D=D,
                                          n_way=n_way, cdt=cdt,
                                          with_logits=return_logits)
    TB = _pick_tasks_per_block(B, budget, footprint, min_grid=2)
    G = B // TB

    out_shape = [jax.ShapeDtypeStruct((G, TB, NKq), jnp.int32)]
    out_specs = [pl.BlockSpec((1, TB, NKq), lambda b: (b, 0, 0))]
    if return_logits:
        out_shape.append(jax.ShapeDtypeStruct((G, TB, n_way, NKq), jnp.float32))
        out_specs.append(pl.BlockSpec((1, TB, n_way, NKq),
                                      lambda b: (b, 0, 0, 0)))

    outs = pl.pallas_call(
        _make_kernel(n_way, return_logits),
        out_shape=tuple(out_shape),
        grid_spec=pltpu.PrefetchScalarGridSpec(
            num_scalar_prefetch=0,
            grid=(G,),
            in_specs=[
                pl.BlockSpec((TB, 1, NKs), lambda b: (b, 0, 0)),
                pl.BlockSpec((TB, NKs, D), lambda b: (b, 0, 0)),
                pl.BlockSpec((TB, D, NKq), lambda b: (b, 0, 0)),
            ],
            out_specs=out_specs,
        ),
        compiler_params=pltpu.CompilerParams(
            dimension_semantics=("parallel",),
            vmem_limit_bytes=int(vmem_limit)),
    )(y, s, qt)

    pred_y = outs[0].reshape(B, N, Kq)
    if not return_logits:
        return pred_y
    # TODO(synk): large-scale consumers should take the kernel-native
    # [B, n_way, N*Kq] logits layout to avoid this extra HBM transpose.
    logits = outs[1].reshape(B, n_way, N, Kq).transpose(0, 2, 3, 1)
    return pred_y, logits


# --------------------------------------------------------------------------- #
# Pure-JAX reference (faithful to the torch forward: mean + sqrt/div)         #
# --------------------------------------------------------------------------- #
def _reference(support_x, support_y, query_x, n_way):
    B, N, Ks, D = support_x.shape
    _, _, Kq, _ = query_x.shape
    hp = jax.lax.Precision.HIGHEST
    y1h = jax.nn.one_hot(support_y, n_way,
                         dtype=support_x.dtype).reshape(B, N * Ks, n_way)
    s = support_x.reshape(B, N * Ks, D)
    q = query_x.reshape(B, N * Kq, D)
    counts = jnp.sum(y1h, axis=1)                                       # [B,N]
    proto = jnp.einsum("bkn,bkd->bnd", y1h, s,
                       precision=hp) / counts[..., None]                # [B,N,D]
    qn = q / jnp.maximum(jnp.linalg.norm(q, axis=-1, keepdims=True), 1e-12)
    pn = proto / jnp.maximum(jnp.linalg.norm(proto, axis=-1, keepdims=True), 1e-12)
    logits = jnp.einsum("bqd,bnd->bqn", qn, pn, precision=hp)
    pred = jnp.argmax(logits, axis=-1).reshape(B, N, Kq).astype(jnp.int32)
    return pred, logits.reshape(B, N, Kq, n_way)


if __name__ == "__main__":
    key = jax.random.PRNGKey(0)
    B, N, Ks, Kq, D = 2, 4, 8, 8, 32   # batch, n_way, k_shot_s, k_shot_q, feat

    kc, k1, k2, k3 = jax.random.split(key, 4)

    # Well-separated class embeddings: keeps the episode realistic and makes
    # the bf16 pred-only path's argmax provably identical to the f32 reference.
    centers = 2.0 * jax.random.normal(kc, (N, D), dtype=jnp.float32)

    # shuffled support labels (each class appears Ks times per task) to
    # exercise the in-kernel one-hot / class-gather path
    base = jnp.repeat(jnp.arange(N, dtype=jnp.int32), Ks)               # [N*Ks]
    perm_keys = jax.random.split(k3, B)
    support_y = jax.vmap(
        lambda k: jax.random.permutation(k, base))(perm_keys).reshape(B, N, Ks)

    support_x = centers[support_y] + \
        0.3 * jax.random.normal(k1, (B, N, Ks, D), dtype=jnp.float32)
    query_x = centers[None, :, None, :] + \
        0.3 * jax.random.normal(k2, (B, N, Kq, D), dtype=jnp.float32)

    # default forward: pred only (matches torch module forward), bf16 MXU path
    pred_y = prototype_net_forward(support_x, support_y, query_x, N)
    pred_y = jax.block_until_ready(pred_y)

    # optional logits output (forward_logits path), f32 end-to-end
    pred_y2, logits = prototype_net_forward(support_x, support_y, query_x, N,
                                            return_logits=True)
    pred_y2 = jax.block_until_ready(pred_y2)
    logits = jax.block_until_ready(logits)

    ref_pred, ref_logits = _reference(support_x, support_y, query_x, N)

    assert pred_y.shape == (B, N, Kq) and pred_y.dtype == jnp.int32
    assert jnp.array_equal(pred_y, ref_pred)
    assert jnp.array_equal(pred_y2, ref_pred)
    # f32 path: post-matmul normalization on unnormalized operands accumulates
    # ~1e-6 extra rounding vs. the normalize-first reference.
    assert jnp.allclose(logits, ref_logits, atol=2e-5, rtol=2e-5)

    print("KERNEL_OK")
</pallas_src>

<mosaic_0001>
module attributes {stable_mosaic.version = 11 : i64} {
  func.func @kernel(%arg0: i32, %arg1: memref<1x1x32xi32, #tpu.memory_space<vmem>>, %arg2: memref<1x32x32xbf16, #tpu.memory_space<vmem>>, %arg3: memref<1x32x32xbf16, #tpu.memory_space<vmem>>, %arg4: memref<1x1x32xi32, #tpu.memory_space<vmem>>) attributes {dimension_semantics = [#tpu.dimension_semantics<parallel>], iteration_bounds = array<i64: 2>, scalar_prefetch = 0 : i64, scratch_operands = 0 : i64, tpu.core_type = #tpu.core_type<tc>, window_params = [{transform_indices = @transform_0, window_bounds = array<i64: 1, 1, 32>}, {transform_indices = @transform_1, window_bounds = array<i64: 1, 32, 32>}, {transform_indices = @transform_2, window_bounds = array<i64: 1, 32, 32>}, {transform_indices = @transform_3, window_bounds = array<i64: 1, 1, 32>}]} {
    %c0 = arith.constant 0 : index
    %c0_0 = arith.constant 0 : index
    %c0_1 = arith.constant 0 : index
    %0 = vector.load %arg1[%c0, %c0_0, %c0_1] : memref<1x1x32xi32, #tpu.memory_space<vmem>>, vector<1x1x32xi32>
    %c0_2 = arith.constant 0 : index
    %c0_3 = arith.constant 0 : index
    %c0_4 = arith.constant 0 : index
    %1 = vector.load %arg2[%c0_2, %c0_3, %c0_4] : memref<1x32x32xbf16, #tpu.memory_space<vmem>>, vector<1x32x32xbf16>
    %c0_5 = arith.constant 0 : index
    %c0_6 = arith.constant 0 : index
    %c0_7 = arith.constant 0 : index
    %2 = vector.load %arg3[%c0_5, %c0_6, %c0_7] : memref<1x32x32xbf16, #tpu.memory_space<vmem>>, vector<1x32x32xbf16>
    %3 = tpu.iota {dimensions = array<i32: 1>} : vector<1x4x32xi32>
    %4 = vector.broadcast %0 : vector<1x1x32xi32> to vector<1x4x32xi32>
    %5 = arith.cmpi eq, %4, %3 : vector<1x4x32xi32>
    %6 = arith.extui %5 : vector<1x4x32xi1> to vector<1x4x32xi32>
    %7 = arith.sitofp %6 : vector<1x4x32xi32> to vector<1x4x32xf32>
    %8 = arith.truncf %7 : vector<1x4x32xf32> to vector<1x4x32xbf16>
    "tpu.trace_start"() <{level = 10 : i32, message = "bnk,bkd->bnd"}> : () -> ()
    %cst = arith.constant dense<0.000000e+00> : vector<1x4x32xf32>
    %9 = tpu.matmul %8, %1, %cst {dimension_numbers = #tpu.dot_dimension_numbers<[2], [1], [1], [2], [0, 0, 0, 1, 1, 2], [0], [0]>} : vector<1x4x32xbf16>, vector<1x32x32xbf16>, vector<1x4x32xf32> -> vector<1x4x32xf32>
    "tpu.trace_stop"() : () -> ()
    %10 = arith.truncf %9 : vector<1x4x32xf32> to vector<1x4x32xbf16>
    "tpu.trace_start"() <{level = 10 : i32, message = "bnd,bdq->bnq"}> : () -> ()
    %cst_8 = arith.constant dense<0.000000e+00> : vector<1x4x32xf32>
    %11 = tpu.matmul %10, %2, %cst_8 {dimension_numbers = #tpu.dot_dimension_numbers<[2], [1], [1], [2], [0, 0, 0, 1, 1, 2], [0], [0]>} : vector<1x4x32xbf16>, vector<1x32x32xbf16>, vector<1x4x32xf32> -> vector<1x4x32xf32>
    "tpu.trace_stop"() : () -> ()
    %12 = arith.mulf %9, %9 : vector<1x4x32xf32>
    %cst_9 = arith.constant dense<0.000000e+00> : vector<1x4xf32>
    %13 = vector.multi_reduction <add>, %12, %cst_9 [2] : vector<1x4x32xf32> to vector<1x4xf32>
    %14 = vector.shape_cast %13 : vector<1x4xf32> to vector<1x4x1xf32>
    %cst_10 = arith.constant 1.000000e-24 : f32
    %15 = vector.broadcast %cst_10 : f32 to vector<1x4x1xf32>
    %16 = arith.maximumf %14, %15 : vector<1x4x1xf32>
    %17 = math.rsqrt %16 : vector<1x4x1xf32>
    %18 = vector.broadcast %17 : vector<1x4x1xf32> to vector<1x4x32xf32>
    %19 = arith.mulf %11, %18 : vector<1x4x32xf32>
    %20 = vector.extract_strided_slice %19 {offsets = [0, 0, 0], sizes = [1, 1, 32], strides = [1, 1, 1]} : vector<1x4x32xf32> to vector<1x1x32xf32>
    %21 = vector.shape_cast %20 : vector<1x1x32xf32> to vector<1x32xf32>
    %c0_i32 = arith.constant 0 : i32
    %22 = vector.broadcast %c0_i32 : i32 to vector<1x32xi32>
    %23 = vector.extract_strided_slice %19 {offsets = [0, 1, 0], sizes = [1, 1, 32], strides = [1, 1, 1]} : vector<1x4x32xf32> to vector<1x1x32xf32>
    %24 = vector.shape_cast %23 : vector<1x1x32xf32> to vector<1x32xf32>
    %25 = arith.cmpf ogt, %24, %21 : vector<1x32xf32>
    %26 = arith.select %25, %24, %21 : vector<1x32xi1>, vector<1x32xf32>
    %c1_i32 = arith.constant 1 : i32
    %27 = vector.broadcast %c1_i32 : i32 to vector<1x32xi32>
    %28 = arith.select %25, %27, %22 : vector<1x32xi1>, vector<1x32xi32>
    %29 = vector.extract_strided_slice %19 {offsets = [0, 2, 0], sizes = [1, 1, 32], strides = [1, 1, 1]} : vector<1x4x32xf32> to vector<1x1x32xf32>
    %30 = vector.shape_cast %29 : vector<1x1x32xf32> to vector<1x32xf32>
    %31 = arith.cmpf ogt, %30, %26 : vector<1x32xf32>
    %32 = arith.select %31, %30, %26 : vector<1x32xi1>, vector<1x32xf32>
    %c2_i32 = arith.constant 2 : i32
    %33 = vector.broadcast %c2_i32 : i32 to vector<1x32xi32>
    %34 = arith.select %31, %33, %28 : vector<1x32xi1>, vector<1x32xi32>
    %35 = vector.extract_strided_slice %19 {offsets = [0, 3, 0], sizes = [1, 1, 32], strides = [1, 1, 1]} : vector<1x4x32xf32> to vector<1x1x32xf32>
    %36 = vector.shape_cast %35 : vector<1x1x32xf32> to vector<1x32xf32>
    %37 = arith.cmpf ogt, %36, %32 : vector<1x32xf32>
    %c3_i32 = arith.constant 3 : i32
    %38 = vector.broadcast %c3_i32 : i32 to vector<1x32xi32>
    %39 = arith.select %37, %38, %34 : vector<1x32xi1>, vector<1x32xi32>
    %c0_11 = arith.constant 0 : index
    %c0_12 = arith.constant 0 : index
    %c0_13 = arith.constant 0 : index
    %40 = vector.load %arg4[%c0_11, %c0_12, %c0_13] : memref<1x1x32xi32, #tpu.memory_space<vmem>>, vector<1x1x32xi32>
    %41 = vector.shape_cast %40 : vector<1x1x32xi32> to vector<1x32xi32>
    %42 = vector.shape_cast %39 : vector<1x32xi32> to vector<1x1x32xi32>
    tpu.vector_store %arg4[%c0_11, %c0_12, %c0_13], %42 {strides = array<i32>} : memref<1x1x32xi32, #tpu.memory_space<vmem>>, vector<1x1x32xi32>,
    return
  }
  func.func @transform_0(%arg0: i32) -> (i32, i32, i32) {
    %c0_i32 = arith.constant 0 : i32
    %c0_i32_0 = arith.constant 0 : i32
    %c0_i32_1 = arith.constant 0 : i32
    return %arg0, %c0_i32, %c0_i32_0 : i32, i32, i32
  }
  func.func @transform_1(%arg0: i32) -> (i32, i32, i32) {
    %c0_i32 = arith.constant 0 : i32
    %c0_i32_0 = arith.constant 0 : i32
    %c0_i32_1 = arith.constant 0 : i32
    return %arg0, %c0_i32, %c0_i32_0 : i32, i32, i32
  }
  func.func @transform_2(%arg0: i32) -> (i32, i32, i32) {
    %c0_i32 = arith.constant 0 : i32
    %c0_i32_0 = arith.constant 0 : i32
    %c0_i32_1 = arith.constant 0 : i32
    return %arg0, %c0_i32, %c0_i32_0 : i32, i32, i32
  }
  func.func @transform_3(%arg0: i32) -> (i32, i32, i32) {
    %c0_i32 = arith.constant 0 : i32
    %c0_i32_0 = arith.constant 0 : i32
    %c0_i32_1 = arith.constant 0 : i32
    return %arg0, %c0_i32, %c0_i32_0 : i32, i32, i32
  }
}

</mosaic_0001>

<bundles_post_ra>
// kernel: tpu_custom_call.1
= control target key start
LH: loop header
LB: loop body
LE: loop exit
PB: predicated region body
PF: predicated region fallthrough
CT: control target
= control target key end

     0   :  { %s972_s0 = inlined_call_operand.hbm [shape: s32[2,1,32], index: 0, kind: input, shape index: {}]   ;;  %s973_s1 = inlined_call_operand.hbm [shape: bf16[2,32,32], index: 1, kind: input, shape index: {}]   ;;  %s974_s2 = inlined_call_operand.hbm [shape: bf16[2,32,32], index: 2, kind: input, shape index: {}]   ;;  %s975_s3 = inlined_call_operand.hbm [shape: s32[2,1,32], index: 3, kind: output, shape index: {}]  }
   0x1   :  { %978 = sst [smem:[#allocation12_spill]] %s973_s1 }
   0x2   :  { %8 = vsyncpa [#allocation3], 0 }
   0x3   :  { %10 = vsyncpa [#allocation3 + $0x1], 0 }
   0x4   :  { %11 = vsyncpa [#allocation6], 0 }
   0x5   :  { %13 = vsyncpa [#allocation6 + $0x1], 0 }
   0x6   :  { %14 = vsyncpa [#allocation4], 0 }
   0x7   :  { %16 = vsyncpa [#allocation4 + $0x1], 0  ;;  %s783_s12 = smov 0   ;;  %s785_s13 = smov 0  }
   0x8   :  { %s787_s14 = smov 0   ;;  %s789_s15 = smov 0  }
   0x9 LB: > { %s804_s16 = sadd.s32 4294967295, %s757_s15   ;;  %s495_s17 = sadd.s32 4294967294, %s757_s15   ;;  %s757_s15 = sphi %s789_s15, %s991_s15   ;;  %s753_s14 = sphi %s787_s14, %s990_s14   ;;  %s749_s13 = sphi %s785_s13, %s989_s13   ;;  %s745_s12 = sphi %s783_s12, %s988_s12  }
   0xa   : > { %s808_s18 = sadd.s32 1, %s757_s15   ;;  %s29_s19 = sadd.s32 1, %s753_s14 }
   0xb   : > { %s26_s20 = ssub.s32 %s757_s15, %s808_s18  ;;  %p36_p0 = scmp.ne.s32.totalorder %s753_s14, %s749_s13 }
   0xc   : > { %p27_p1 = scmp.eq.s32.totalorder %s26_s20, 0  ;;  %p37_p2 = scmp.eq.s32.totalorder %s757_s15, 0 }
   0xd   : > { %p42_p3 = scmp.ne.s32.totalorder %s749_s13, %s745_s12  ;;  %p43_p4 = scmp.eq.s32.totalorder %s804_s16, 0 }
   0xe   : > { %s820_s21 = scalar_select %p27_p1, %s753_s14, %s29_s19  }
   0xf   : > { %p38_p5 = por %p37_p2, %p36_p0  ;;  %p822_p6 = por %p43_p4, %p42_p3 }
  0x10   : > { %p118_p7 = scmp.eq.s32.totalorder %s804_s16, 1  ;;  %p124_p8 = scmp.eq.s32.totalorder %s495_s17, 1 }
  0x11   : > { %p556_p10 = scmp.lt.s32.totalorder %s757_s15, 2  ;;  %s838_s25 = sand.u32 1, %s753_s14  }
  0x12   : > { %p829_p11 = por %p118_p7, %p36_p0  ;;  %p833_p12 = por %p124_p8, %p42_p3 }
  0x13   : > { %p840_p13 = pnand %p556_p10, %p38_p5  ;;  %s161_s27 = sand.u32 1, %s757_s15  }
  0x14   : > { %s498_s28 = sshll.u32 %s838_s25, 4  ;;  %s528_s29 = sshll.u32 %s757_s15, 4 }
  0x15   : > { %s983_s1 = sld [smem:[#allocation12_spill]]  ;;  %s165_s6 = scalar_lea.vmem [#allocation5], %s498_s28 }
  0x16   : > { %s173_s7 = sshll.u32 %s165_s6, 4  ;;  %s852_s9 = scalar_lea.sflag [#allocation6], %s161_s27  ;;  %s174_s7 = int_to_ptr.vmem [resolvable:$true] %s173_s7 }
  0x17   : > { %p601_p1 = pneg %p840_p13 }
  0x1b   : > { %s170_s5 = scalar_lea.hbm %s983_s1, %s528_s29  ;;  %s604_s20 = scalar_lea.hbm %s983_s1, 32 }
  0x1c   : > { %s171_s8 = sshll.u32 %s170_s5, 4  ;;  %s172_s8 = int_to_ptr.hbm [resolvable:$true] %s171_s8 }
  0x1d   : > { %s597_s10 = sshra.s32 %s172_s8, 4  ;;  %s598_s10 = int_to_ptr.hbm [resolvable:$true] %s597_s10 }
  0x1e   : > { %s599_s11 = scalar_lea.hbm %s598_s10, 16  ;;  %p605_p4 = scmp.lt.s32.totalorder %s598_s10, %s983_s1 }
  0x1f   : > { %p600_p0 = scmp.ne.s32.totalorder %s598_s10, %s599_s11  ;;  %p606_p5 = scmp.lt.s32.totalorder %s604_s20, %s599_s11 }
  0x21   : > { %p602_p2 = pnand %p601_p1, %p600_p0  ;;  %p607_p7 = por %p606_p5, %p605_p4 }
  0x23   : > { %p603_p3 = pneg %p602_p2 }
  0x25   : > { %p608_p8 = pnand %p607_p7, %p603_p3 }
  0x27   : > { %611 = shalt.err (!%p608_p8)
}
  0x28   : > { %s976_s27 = smov 64   ;;  %s977_s5 = smov 4  }
  0x29   : > { %548 = dma.hbm_to_vmem [thread:$0]  (!%p840_p13), %s172_s8, 256, %s174_s7, %s852_s9, %s976_s27, %s976_s27, %s977_s5  }
  0x2a   : > { %s192_s11 = scalar_lea.hbm %s974_s2, %s528_s29  ;;  %s187_s17 = scalar_lea.vmem [#allocation7], %s498_s28 }
  0x2b   : > { %s195_s19 = sshll.u32 %s187_s17, 4  ;;  %s193_s20 = sshll.u32 %s192_s11, 4  ;;  %s876_s19 = int_to_ptr.vmem [resolvable:$true] %s195_s19  ;;  %s878_s20 = int_to_ptr.hbm [resolvable:$true] %s193_s20 }
  0x2c   : > { %p504_p10 = scmp.ge.s32.totalorder %s757_s15, 1  ;;  %p203_p0 = scmp.lt.s32.totalorder %s757_s15, 3 }
  0x2d   : > { %s150_s7 = scalar_lea.hbm %s972_s0, %s757_s15  ;;  %s147_s28 = scalar_lea.vmem [#allocation2], %s838_s25 }
  0x2e   : > { %p886_p2 = pnand %p504_p10, %p203_p0  ;;  %s152_s29 = sshll.u32 %s150_s7, 4  ;;  %s153_s29 = int_to_ptr.hbm [resolvable:$true] %s152_s29 }
  0x2f   : > { %s154_s6 = sshll.u32 %s147_s28, 4  ;;  %s145_s10 = scalar_lea.sflag [#allocation3], %s838_s25  ;;  %s155_s6 = int_to_ptr.vmem [resolvable:$true] %s154_s6 }
  0x30   : > { %s627_s11 = sshra.s32 %s153_s29, 4  ;;  %s634_s27 = scalar_lea.hbm %s972_s0, 2  ;;  %s628_s11 = int_to_ptr.hbm [resolvable:$true] %s627_s11 }
  0x31   : > { %s629_s17 = scalar_lea.hbm %s628_s11, 1  ;;  %p635_p7 = scmp.lt.s32.totalorder %s628_s11, %s972_s0 }
  0x32   : > { %p630_p3 = scmp.ne.s32.totalorder %s628_s11, %s629_s17  ;;  %p636_p8 = scmp.lt.s32.totalorder %s634_s27, %s629_s17 }
  0x34   : > { %p632_p4 = pnand %p630_p3, %p601_p1  ;;  %p637_p10 = por %p636_p8, %p635_p7 }
  0x36   : > { %p633_p5 = pneg %p632_p4 }
  0x38   : > { %p638_p0 = pnand %p637_p10, %p633_p5 }
  0x3a   : > { %641 = shalt.err (!%p638_p0)
}
  0x3b   : > { %545 = dma.hbm_to_vmem [thread:$0]  (!%p840_p13), %s153_s29, 16, %s155_s6, %s145_s10  }
  0x3c   : > { %s657_s25 = sshra.s32 %s878_s20, 4  ;;  %s664_s27 = scalar_lea.hbm %s974_s2, 32  ;;  %s658_s25 = int_to_ptr.hbm [resolvable:$true] %s657_s25 }
  0x3d   : > { %s659_s7 = scalar_lea.hbm %s658_s25, 16  ;;  %p665_p5 = scmp.lt.s32.totalorder %s658_s25, %s974_s2 }
  0x3e   : > { %p660_p3 = scmp.ne.s32.totalorder %s658_s25, %s659_s7  ;;  %p666_p7 = scmp.lt.s32.totalorder %s664_s27, %s659_s7 }
  0x40   : > { %p662_p4 = pnand %p660_p3, %p601_p1  ;;  %p667_p8 = por %p666_p7, %p665_p5 }
  0x42   : > { %p663_p9 = pneg %p662_p4 }
  0x44   : > { %p668_p10 = pnand %p667_p8, %p663_p9 }
  0x46   : > { %671 = shalt.err (!%p668_p10)
}
  0x47   : > { %s985_s29 = smov 4   ;;  %s986_s6 = smov 64  }
  0x48   : > { %551 = dma.hbm_to_vmem [thread:$0]  (!%p840_p13), %s878_s20, 256, %s876_s19, %s852_s9, %s986_s6, %s986_s6, %s985_s29  }
  0x49   : > { %207 = sbr.rel (%p886_p2) target bundleno = 372 (0x174), region = 32  ;;  %s924_s10 = sand.u32 (!%p886_p2), 1, %s749_s13  }
  0x4a   : > { %s210_s17 = scalar_lea.sflag (!%p886_p2), [#allocation3], %s924_s10  ;;  %s212_s30 = scalar_lea.vmem (!%p886_p2), [#allocation2], %s924_s10 }
  0x4e   : > { %732 = dma.done.wait (%p822_p6), %s210_s17, 16  }
  0x4f   : > { %734 = vsyncadd (%p822_p6), %s210_s17, 4294967280  ;;  %s218_s26 = sand.u32 1, %s804_s16   ;;  %s505_s9 = sshll.u32 %s924_s10, 4 }
  0x50   : > { %s219_s19 = scalar_lea.sflag [#allocation6], %s218_s26  ;;  %s222_s20 = scalar_lea.vmem [#allocation5], %s505_s9 }
  0x51   : > { %736 = dma.done.wait (%p822_p6), %s219_s19, 512  }
  0x52   : > { %738 = vsyncadd (%p822_p6), %s219_s19, 4294966784  ;;  %v274_v0 = vlaneseq  ;;  %v531_v2 = vld [vmem:[%s222_s20 + $0x8] sm:$0xff]  ;;  %s232_s8 = scalar_lea.vmem [#allocation7], %s505_s9  ;;  %v530_v5 = vld [vmem:[%s222_s20] sm:$0xff]  ;;  %v761_v6 = vmov 0.0   ;;  %vm293_vm1 = vcmask 261120   ;;  %s386_s25 = scalar_lea.hbm %s975_s3, %s804_s16 }
  0x53   : > { %v594_v3 = vld [vmem:[%s212_s30] ss:$0 sm:$0xff]  ;;  %303 = vmatpush.bf16.msra.mxu0 %v531_v2  ;;  %v532_v9 = vld [vmem:[%s232_s8] sm:$0xff]  ;;  %vm340_vm2 = vcmask 257024   ;;  %v762_v29 = vmov 0   ;;  %s263_s7 = scalar_lea.vmem [#allocation8], %s924_s10 }
  0x54   : > { %v275_v1 = vshrl.u32 %v274_v0, 7  ;;  %v533_v4 = vld [vmem:[%s232_s8 + $0x8] sm:$0xff]  ;;  %s388_s28 = sshll.u32 %s263_s7, 4  ;;  %s390_s1 = sshll.u32 %s386_s25, 4  ;;  %vm375_vm8 = vcmask 257027   ;;  %s389_s28 = int_to_ptr.vmem [resolvable:$true] %s388_s28  ;;  %s391_s1 = int_to_ptr.hbm [resolvable:$true] %s390_s1 }
  0x55   : > { %332 = vmatpush.bf16.msra.mxu1 %v533_v4  ;;  %s378_s27 = scalar_lea.sflag [#allocation4], %s924_s10  ;;  %s701_s5 = sshra.s32 %s391_s1, 4  ;;  %s702_s5 = int_to_ptr.hbm [resolvable:$true] %s701_s5 }
  0x56   : > { %vm277_vm0 = vcmp.eq.s32.totalorder %v594_v3, %v275_v1  ;;  %s703_s11 = scalar_lea.hbm %s702_s5, 1  ;;  %s707_s6 = scalar_lea.hbm %s975_s3, 2 }
  0x57   : > { %v507_v7 = vsel %vm277_vm0, 1.0, %v761_v6  ;;  %304 = vmatpush.bf16.msra.mxu0 %v530_v5  ;;  %p704_p6 = scmp.ne.s32.totalorder %s702_s5, %s703_s11  ;;  %p708_p1 = scmp.lt.s32.totalorder %s702_s5, %s975_s3 }
  0x58   : > { %v280_v8 = vpack.c.bf16 %v507_v7, %v507_v7  ;;  %p709_p2 = scmp.lt.s32.totalorder %s707_s6, %s703_s11 }
  0x59   : > { %333 = vmatpush.bf16.msra.mxu1 %v532_v9  ;;  %p705_p9 = pnand %p704_p6, %p829_p11 }
  0x5a   : > { %516 = vmatmul.msk.bf16.vlgmr.msra.gmra.mxu0 %vm293_vm1, %v280_v8  ;;  %p710_p0 = por %p709_p2, %p708_p1 }
  0x5b   : > { %p706_p13 = pneg %p705_p9 }
  0x5d   : > { %p711_p3 = pnand %p710_p0, %p706_p13 }
  0xd7   : > { %v306_v10 = vpop.f32.mrf.mxu0 }
  0xd8   : > { %v310_v11 = vpack.c.bf16 %v306_v10, %v306_v10  ;;  %v339_v12 = vmul.f32 %v306_v10, %v306_v10 }
  0xda   : > { %525 = vmatmul.msk.bf16.vlgmr.msra.gmra.mxu1 %vm293_vm1, %v310_v11  ;;  %v341_v13 = vsel %vm340_vm2, %v339_v12, 0.0 }
  0xdb   : > { %342 = vadd.xlane.f32.xlu0 %v341_v13 }
  0xdf   : > { %v308_v14 = vpop.f32.mrf.mxu0 }
 0x14e   : > { %v343_v15 = vpop.xlane.xlu0 %342 }
 0x14f   : > { %v344_v16 = vmax.f32 %v343_v15, 1e-24 }
 0x151   : > { %595 = vrsqrt.f32 %v344_v16  ;;  %vm351_vm4 = vweird.f32 %v344_v16 }
 0x157   : > { %v596_v17 = vpop.eup %595  ;;  %v335_v18 = vpop.f32.mrf.mxu1 }
 0x158   : > { %v346_v19 = vmul.f32 %v596_v17, %v344_v16  ;;  %vm352_vm3 = vweird.f32 %v596_v17 }
 0x159   : > { %vm353_vm5 = vmor %vm351_vm4, %vm352_vm3 }
 0x15a   : > { %v347_v20 = vmul.f32 %v596_v17, %v346_v19 }
 0x15c   : > { %v348_v21 = vmul.f32 0.5, %v347_v20 }
 0x15e   : > { %v349_v22 = vsub.f32 1.5, %v348_v21 }
 0x15f   : > { %v337_v23 = vpop.f32.mrf.mxu1 }
 0x160   : > { %v350_v24 = vmul.f32 %v596_v17, %v349_v22 }
 0x162   : > { %v354_v25 = vsel %vm353_vm5, %v596_v17, %v350_v24 }
 0x163   : > { %v355_v26 = vmul.f32 %v354_v25, %v335_v18 }
 0x165   : > { %v357_v27 = vrot.slane %v355_v26, 7 }
 0x167   : > { %vm359_vm6 = vcmp.gt.f32.partialorder %v355_v26, %v357_v27 }
 0x168   : > { %v360_v28 = vsel %vm359_vm6, %v355_v26, %v357_v27  ;;  %v361_v30 = vsel %vm359_vm6, 1, %v762_v29 }
 0x169   : > { %v363_v31 = vrot.slane %v360_v28, 7  ;;  %v367_v32 = vrot.slane %v361_v30, 7 }
 0x16b   : > { %vm365_vm7 = vcmp.gt.f32.partialorder %v355_v26, %v363_v31 }
 0x16c   : > { %v366_v33 = vsel %vm365_vm7, %v355_v26, %v363_v31  ;;  %v368_v34 = vsel %vm365_vm7, 2, %v367_v32 }
 0x16d   : > { %v370_v35 = vrot.slane %v366_v33, 7  ;;  %v373_v36 = vrot.slane %v368_v34, 7 }
 0x16f   : > { %vm372_vm9 = vcmp.gt.f32.partialorder %v355_v26, %v370_v35 }
 0x170   : > { %v374_v37 = vsel %vm372_vm9, 3, %v373_v36 }
 0x171   : > { %376 = vst.msk [vmem:[%s263_s7 - $0x3] sm:$0x8] %vm375_vm8, %v374_v37 }
 0x172   : > { %714 = shalt.err (!%p711_p3)
}
 0x173   : > { %540 = dma.vmem_to_hbm [thread:$0]  (%p829_p11), %s389_s28, 16, %s391_s1, %s378_s27  }
 0x174 PF: > { %s402_s10 = sand.u32 1, %s745_s12   ;;  %p987_p4 = scmp.ge.s32.totalorder %s757_s15, 2 }
 0x175   : > { %s403_s26 = scalar_lea.sflag [#allocation4], %s402_s10 }
 0x176   : > { %p553_p5 = pnand %p987_p4, %p833_p12 }
 0x178   : > { %p554_p7 = pneg %p553_p5 }
 0x17a   : > { %740 = dma.done.wait (%p554_p7), %s403_s26, 16  }
 0x17b   : > { %742 = vsyncadd (%p554_p7), %s403_s26, 4294967280  ;;  %p19_p8 = scmp.ge.s32.totalorder %s808_s18, 4   ;;  %s988_s12 = smov %s749_s13 }
 0x17c   : > { %s989_s13 = smov %s753_s14  ;;  %s990_s14 = smov %s820_s21 }
 0x17d   : > { %s991_s15 = smov %s808_s18  ;;  %21 = sbr.rel (!%p19_p8) target bundleno = 9 (0x9), region = 101 }
 0x182   :  { %408 = vsyncpa [#allocation3], 1 }
 0x183   :  { %410 = vsyncpa [#allocation3 + $0x1], 1 }
 0x184   :  { %411 = vsyncpa [#allocation6], 1 }
 0x185   :  { %413 = vsyncpa [#allocation6 + $0x1], 1 }
 0x186   :  { %414 = vsyncpa [#allocation4], 1 }
 0x187   :  { %416 = vsyncpa [#allocation4 + $0x1], 1 }

</bundles_post_ra>
